<compile_context>
chip_gen: v5e
topology: v5e:2x2
jax: 0.10.0
libtpu: 0.0.40
codegen_flags: <defaults>
</compile_context>

<pallas_src>
import jax
import jax.numpy as jnp
from jax import lax
from jax.experimental import pallas as pl
from jax.experimental.pallas import tpu as pltpu


# ---------------------------------------------------------------------------
# Kernel 1: fused linear+sigmoid + concat-projection, tiled over time-major rows.
#   rows are time-major flattened (T*B); output x_embedded of shape (T*B, N) bf16
# ---------------------------------------------------------------------------
def _proj_kernel(bert_ref, virt_ref, w1_ref, b1_ref, w2b_ref, w2e_ref, b2_ref,
                 x_ref):
    # virtuoso_input -> linear -> sigmoid   (bf16 matmul, f32 accumulate)
    v = jax.nn.sigmoid(
        jnp.dot(virt_ref[...], w1_ref[...], preferred_element_type=jnp.float32)
        + b1_ref[...])
    # cat((bert, v), -1) @ W2 + b2  ==  bert @ W2_bert + v @ W2_emb + b2
    x = (jnp.dot(bert_ref[...], w2b_ref[...], preferred_element_type=jnp.float32)
         + jnp.dot(v.astype(w2e_ref.dtype), w2e_ref[...],
                   preferred_element_type=jnp.float32)
         + b2_ref[...])
    # Stored bf16: x is only consumed as a bf16 MXU operand in the LSTM kernel,
    # so this halves the intermediate HBM traffic losslessly.
    x_ref[...] = x.astype(x_ref.dtype)


# ---------------------------------------------------------------------------
# Kernel 2: bidirectional LSTM recurrence, time-major, gridded over batch tiles.
#           Both directions interleaved in one fori_loop, length-masked.
# ---------------------------------------------------------------------------
def _bilstm_kernel(len_ref, x_ref, wihf_ref, whhf_ref, bgf_ref,
                   wihb_ref, whhb_ref, bgb_ref, out_ref):
    T, Bt, N = x_ref.shape
    lens = len_ref[...]                       # (Bt, 1) int32 -- hoisted
    # Loop-invariant weight / bias loads hoisted out of the recurrence.
    wif = wihf_ref[...]                       # (N, 4N) bf16
    whf = whhf_ref[...]
    wib = wihb_ref[...]
    whb = whhb_ref[...]
    bgf = jnp.broadcast_to(bgf_ref[...], (Bt, 4 * N))   # f32, hoisted broadcast
    bgb = jnp.broadcast_to(bgb_ref[...], (Bt, 4 * N))

    def cell(gates, c):                       # gates: (Bt, 4N) f32, order i,f,g,o
        i = jax.nn.sigmoid(gates[:, 0 * N:1 * N])
        f = jax.nn.sigmoid(gates[:, 1 * N:2 * N])
        g = jnp.tanh(gates[:, 2 * N:3 * N])
        o = jax.nn.sigmoid(gates[:, 3 * N:4 * N])
        c_new = f * c + i * g
        h_new = o * jnp.tanh(c_new)
        return h_new, c_new

    def body(s, carry):
        h_f, c_f, h_b, c_b = carry
        t_b = T - 1 - s
        x_f = x_ref[s]                        # (Bt, N) bf16, dense time-major slab
        x_b = x_ref[t_b]
        # x @ Wih has no dependence on the carry -> overlaps with the serial
        # h @ Whh -> gates -> h chain; only the small recurrent matmul is truly
        # on the dependency path.  Forward/backward work is independent and
        # co-issues in the same bundles.
        gates_f = (jnp.dot(x_f, wif, preferred_element_type=jnp.float32) + bgf
                   + jnp.dot(h_f.astype(whf.dtype), whf,
                             preferred_element_type=jnp.float32))
        gates_b = (jnp.dot(x_b, wib, preferred_element_type=jnp.float32) + bgb
                   + jnp.dot(h_b.astype(whb.dtype), whb,
                             preferred_element_type=jnp.float32))
        hf_new, cf_new = cell(gates_f, c_f)
        hb_new, cb_new = cell(gates_b, c_b)
        mask_f = s < lens                     # (Bt, 1) packed-seq masking
        mask_b = t_b < lens
        # Fused (T, Bt, 2N) output: forward half lanes [0:N], backward [N:2N].
        out_ref[s, :, 0:N] = jnp.where(mask_f, hf_new, 0.0)
        out_ref[t_b, :, N:2 * N] = jnp.where(mask_b, hb_new, 0.0)
        return (jnp.where(mask_f, hf_new, h_f), jnp.where(mask_f, cf_new, c_f),
                jnp.where(mask_b, hb_new, h_b), jnp.where(mask_b, cb_new, c_b))

    zero = jnp.zeros((Bt, N), jnp.float32)
    lax.fori_loop(0, T, body, (zero, zero, zero, zero),
                  unroll=True if T <= 16 else 4)


# ---------------------------------------------------------------------------
# Parameter init (deterministic, synthetic). Weights bf16 (MXU path), biases f32.
# ---------------------------------------------------------------------------
def init_params(key, input_size, bert_hidden_size, embedding_size, note_size):
    ks = jax.random.split(key, 11)
    s = 0.1
    bf16, f32 = jnp.bfloat16, jnp.float32
    n = note_size
    return {
        # nn.Linear(input_size, embedding_size)  (stored transposed: (in, out))
        "w1": (s * jax.random.normal(ks[0], (input_size, embedding_size), f32)).astype(bf16),
        "b1": s * jax.random.normal(ks[1], (1, embedding_size), f32),
        # nn.Linear(embedding_size + bert_hidden_size, note_size), split by input halves
        "w2b": (s * jax.random.normal(ks[2], (bert_hidden_size, n), f32)).astype(bf16),
        "w2e": (s * jax.random.normal(ks[3], (embedding_size, n), f32)).astype(bf16),
        "b2": s * jax.random.normal(ks[4], (1, n), f32),
        # LSTM forward: W_ih (N,4N), W_hh (N,4N), folded bias b_ih+b_hh (1,4N)
        "wih_f": (s * jax.random.normal(ks[5], (n, 4 * n), f32)).astype(bf16),
        "whh_f": (s * jax.random.normal(ks[6], (n, 4 * n), f32)).astype(bf16),
        "bg_f": s * jax.random.normal(ks[7], (1, 4 * n), f32),
        # LSTM backward
        "wih_b": (s * jax.random.normal(ks[8], (n, 4 * n), f32)).astype(bf16),
        "whh_b": (s * jax.random.normal(ks[9], (n, 4 * n), f32)).astype(bf16),
        "bg_b": s * jax.random.normal(ks[10], (1, 4 * n), f32),
    }


def _pick_tile(m, candidates):
    for t in candidates:
        if m % t == 0:
            return t
    return m  # full extent (allowed by the (8,128) rule)


# ---------------------------------------------------------------------------
# Forward wrapper (mirrors AlignLSTM.forward, batch_first=True)
# ---------------------------------------------------------------------------
def align_lstm_forward(bert_output, virtuoso_input, lengths, params):
    B, T, Hb = bert_output.shape
    In = virtuoso_input.shape[-1]
    E = params["w1"].shape[1]
    N = params["w2e"].shape[1]

    # Time-major flatten so the LSTM sees lane/sublane-dense per-step slabs.
    bert_tm = jnp.transpose(bert_output, (1, 0, 2)).reshape(T * B, Hb).astype(jnp.bfloat16)
    virt_tm = jnp.transpose(virtuoso_input, (1, 0, 2)).reshape(T * B, In).astype(jnp.bfloat16)

    M = T * B
    TILE_M = _pick_tile(M, (512, 256, 128, 64, 32, 16, 8))

    x_tm = pl.pallas_call(
        _proj_kernel,
        out_shape=jax.ShapeDtypeStruct((M, N), jnp.bfloat16),
        grid=(M // TILE_M,),
        in_specs=[
            pl.BlockSpec((TILE_M, Hb), lambda i: (i, 0)),
            pl.BlockSpec((TILE_M, In), lambda i: (i, 0)),
            pl.BlockSpec((In, E), lambda i: (0, 0)),
            pl.BlockSpec((1, E), lambda i: (0, 0)),
            pl.BlockSpec((Hb, N), lambda i: (0, 0)),
            pl.BlockSpec((E, N), lambda i: (0, 0)),
            pl.BlockSpec((1, N), lambda i: (0, 0)),
        ],
        out_specs=pl.BlockSpec((TILE_M, N), lambda i: (i, 0)),
        compiler_params=pltpu.CompilerParams(dimension_semantics=("parallel",)),
    )(bert_tm, virt_tm, params["w1"], params["b1"], params["w2b"], params["w2e"],
      params["b2"])

    # Time-major x for the recurrence (contiguous reshape, last dim unchanged).
    x3 = x_tm.reshape(T, B, N)
    len_arr = jnp.asarray(lengths, jnp.int32).reshape(B, 1)

    # Batch-tiled grid: independent sequences -> "parallel" (megacore on v7x),
    # bounded per-tile VMEM, pipelined x / output slabs.
    TILE_B = _pick_tile(B, (8,))
    out_tm = pl.pallas_call(
        _bilstm_kernel,
        out_shape=jax.ShapeDtypeStruct((T, B, 2 * N), jnp.float32),
        grid=(B // TILE_B,),
        in_specs=[
            pl.BlockSpec((TILE_B, 1), lambda i: (i, 0)),
            pl.BlockSpec((T, TILE_B, N), lambda i: (0, i, 0)),
            pl.BlockSpec((N, 4 * N), lambda i: (0, 0)),
            pl.BlockSpec((N, 4 * N), lambda i: (0, 0)),
            pl.BlockSpec((1, 4 * N), lambda i: (0, 0)),
            pl.BlockSpec((N, 4 * N), lambda i: (0, 0)),
            pl.BlockSpec((N, 4 * N), lambda i: (0, 0)),
            pl.BlockSpec((1, 4 * N), lambda i: (0, 0)),
        ],
        out_specs=pl.BlockSpec((T, TILE_B, 2 * N), lambda i: (0, i, 0)),
        compiler_params=pltpu.CompilerParams(dimension_semantics=("parallel",)),
    )(len_arr, x3, params["wih_f"], params["whh_f"], params["bg_f"],
      params["wih_b"], params["whh_b"], params["bg_b"])
    # TODO(synk): for very long T, add a (carried) time-chunk axis so the x block
    # stays within the 64 MiB v7x VMEM budget.

    # Back to batch-first; pad_packed_sequence(batch_first=True) trims to max(lengths).
    out = jnp.transpose(out_tm, (1, 0, 2))
    t_max = int(max(lengths))
    return out[:, :t_max, :]


# ---------------------------------------------------------------------------
# Pure-JAX reference (same bf16-in / f32-accumulate precision as the kernels).
# ---------------------------------------------------------------------------
def _ref_forward(bert_output, virtuoso_input, lengths, params):
    B, T, _ = bert_output.shape
    N = params["w2e"].shape[1]
    f32 = jnp.float32

    def mm(a, w):
        return jnp.dot(a.astype(jnp.bfloat16), w.astype(jnp.bfloat16),
                       preferred_element_type=f32)

    v = jax.nn.sigmoid(mm(virtuoso_input, params["w1"]) + params["b1"])
    x = mm(bert_output, params["w2b"]) + mm(v, params["w2e"]) + params["b2"]  # (B,T,N)
    lens = jnp.asarray(lengths, jnp.int32)

    def run_dir(wih, whh, bg, reverse):
        def step(carry, xt_t):
            h, c = carry
            xt, t = xt_t
            gates = mm(xt, wih) + mm(h, whh) + bg
            i = jax.nn.sigmoid(gates[:, 0 * N:1 * N])
            f = jax.nn.sigmoid(gates[:, 1 * N:2 * N])
            g = jnp.tanh(gates[:, 2 * N:3 * N])
            o = jax.nn.sigmoid(gates[:, 3 * N:4 * N])
            c_new = f * c + i * g
            h_new = o * jnp.tanh(c_new)
            mask = (t < lens)[:, None]
            h_out = jnp.where(mask, h_new, 0.0)
            return (jnp.where(mask, h_new, h), jnp.where(mask, c_new, c)), h_out

        x_tm = jnp.transpose(x, (1, 0, 2))
        ts = jnp.arange(T, dtype=jnp.int32)
        if reverse:
            x_tm, ts = x_tm[::-1], ts[::-1]
        zero = jnp.zeros((B, N), f32)
        _, hs = lax.scan(step, (zero, zero), (x_tm, ts))
        if reverse:
            hs = hs[::-1]
        return jnp.transpose(hs, (1, 0, 2))

    hf = run_dir(params["wih_f"], params["whh_f"], params["bg_f"], False)
    hb = run_dir(params["wih_b"], params["whh_b"], params["bg_b"], True)
    out = jnp.concatenate([hf, hb], axis=-1)
    return out[:, :int(max(lengths)), :]


if __name__ == "__main__":
    key = jax.random.PRNGKey(0)
    B, T = 2, 8
    # note_size chosen as a multiple of 128 so every gate slice is lane-aligned.
    input_size, bert_hidden_size, embedding_size, note_size = 16, 768, 32, 128

    k1, k2, k3 = jax.random.split(key, 3)
    bert_output = jax.random.normal(k1, (B, T, bert_hidden_size), jnp.float32)
    virtuoso_input = jax.random.normal(k2, (B, T, input_size), jnp.float32)
    lengths = [8, 5]  # variable-length sequences (enforce_sorted=False semantics)

    params = init_params(k3, input_size, bert_hidden_size, embedding_size, note_size)

    out = align_lstm_forward(bert_output, virtuoso_input, lengths, params)
    jax.block_until_ready(out)

    expected_shape = (B, max(lengths), 2 * note_size)
    assert out.shape == expected_shape, (out.shape, expected_shape)
    assert bool(jnp.all(jnp.isfinite(out)))
    # packed-sequence semantics: steps beyond each sequence length are zero
    assert bool(jnp.all(out[1, lengths[1]:, :] == 0.0))

    # Correctness vs. pure-JAX reference at matching precision.
    ref = _ref_forward(bert_output, virtuoso_input, lengths, params)
    max_err = float(jnp.max(jnp.abs(out - ref)))
    assert max_err < 1e-2, max_err

    print("KERNEL_OK")
</pallas_src>

<mosaic_0001>
module attributes {stable_mosaic.version = 11 : i64} {
  func.func @_proj_kernel(%arg0: i32, %arg1: memref<16x768xbf16, #tpu.memory_space<vmem>>, %arg2: memref<16x16xbf16, #tpu.memory_space<vmem>>, %arg3: memref<16x32xbf16, #tpu.memory_space<vmem>>, %arg4: memref<1x32xf32, #tpu.memory_space<vmem>>, %arg5: memref<768x128xbf16, #tpu.memory_space<vmem>>, %arg6: memref<32x128xbf16, #tpu.memory_space<vmem>>, %arg7: memref<1x128xf32, #tpu.memory_space<vmem>>, %arg8: memref<16x128xbf16, #tpu.memory_space<vmem>>) attributes {dimension_semantics = [#tpu.dimension_semantics<parallel>], iteration_bounds = array<i64: 1>, scalar_prefetch = 0 : i64, scratch_operands = 0 : i64, tpu.core_type = #tpu.core_type<tc>, window_params = [{transform_indices = @transform_0, window_bounds = array<i64: 16, 768>}, {transform_indices = @transform_1, window_bounds = array<i64: 16, 16>}, {pipeline_mode = #tpu.pipeline_mode<synchronous>, transform_indices = @transform_2, window_bounds = array<i64: 16, 32>}, {pipeline_mode = #tpu.pipeline_mode<synchronous>, transform_indices = @transform_3, window_bounds = array<i64: 1, 32>}, {pipeline_mode = #tpu.pipeline_mode<synchronous>, transform_indices = @transform_4, window_bounds = array<i64: 768, 128>}, {pipeline_mode = #tpu.pipeline_mode<synchronous>, transform_indices = @transform_5, window_bounds = array<i64: 32, 128>}, {pipeline_mode = #tpu.pipeline_mode<synchronous>, transform_indices = @transform_6, window_bounds = array<i64: 1, 128>}, {transform_indices = @transform_7, window_bounds = array<i64: 16, 128>}]} {
    %c0 = arith.constant 0 : index
    %c0_0 = arith.constant 0 : index
    %0 = vector.load %arg2[%c0, %c0_0] : memref<16x16xbf16, #tpu.memory_space<vmem>>, vector<16x16xbf16>
    %c0_1 = arith.constant 0 : index
    %c0_2 = arith.constant 0 : index
    %1 = vector.load %arg3[%c0_1, %c0_2] : memref<16x32xbf16, #tpu.memory_space<vmem>>, vector<16x32xbf16>
    %cst = arith.constant dense<0.000000e+00> : vector<16x32xf32>
    %2 = tpu.matmul %0, %1, %cst {dimension_numbers = #tpu.dot_dimension_numbers<[1], [0], [0], [1], [0, 0, 1, 1], [], []>} : vector<16x16xbf16>, vector<16x32xbf16>, vector<16x32xf32> -> vector<16x32xf32>
    %c0_3 = arith.constant 0 : index
    %c0_4 = arith.constant 0 : index
    %3 = vector.load %arg4[%c0_3, %c0_4] : memref<1x32xf32, #tpu.memory_space<vmem>>, vector<1x32xf32>
    %4 = vector.broadcast %3 : vector<1x32xf32> to vector<16x32xf32>
    %5 = arith.addf %2, %4 : vector<16x32xf32>
    %6 = arith.negf %5 : vector<16x32xf32>
    %7 = math.exp %6 : vector<16x32xf32>
    %cst_5 = arith.constant 1.000000e+00 : f32
    %8 = vector.broadcast %cst_5 : f32 to vector<16x32xf32>
    %9 = arith.addf %8, %7 : vector<16x32xf32>
    %10 = arith.divf %8, %9 : vector<16x32xf32>
    %c0_6 = arith.constant 0 : index
    %c0_7 = arith.constant 0 : index
    %11 = vector.load %arg1[%c0_6, %c0_7] : memref<16x768xbf16, #tpu.memory_space<vmem>>, vector<16x768xbf16>
    %c0_8 = arith.constant 0 : index
    %c0_9 = arith.constant 0 : index
    %12 = vector.load %arg5[%c0_8, %c0_9] : memref<768x128xbf16, #tpu.memory_space<vmem>>, vector<768x128xbf16>
    %cst_10 = arith.constant dense<0.000000e+00> : vector<16x128xf32>
    %13 = tpu.matmul %11, %12, %cst_10 {dimension_numbers = #tpu.dot_dimension_numbers<[1], [0], [0], [1], [0, 0, 1, 1], [], []>} : vector<16x768xbf16>, vector<768x128xbf16>, vector<16x128xf32> -> vector<16x128xf32>
    %14 = arith.truncf %10 : vector<16x32xf32> to vector<16x32xbf16>
    %c0_11 = arith.constant 0 : index
    %c0_12 = arith.constant 0 : index
    %15 = vector.load %arg6[%c0_11, %c0_12] : memref<32x128xbf16, #tpu.memory_space<vmem>>, vector<32x128xbf16>
    %cst_13 = arith.constant dense<0.000000e+00> : vector<16x128xf32>
    %16 = tpu.matmul %14, %15, %cst_13 {dimension_numbers = #tpu.dot_dimension_numbers<[1], [0], [0], [1], [0, 0, 1, 1], [], []>} : vector<16x32xbf16>, vector<32x128xbf16>, vector<16x128xf32> -> vector<16x128xf32>
    %17 = arith.addf %13, %16 : vector<16x128xf32>
    %c0_14 = arith.constant 0 : index
    %c0_15 = arith.constant 0 : index
    %18 = vector.load %arg7[%c0_14, %c0_15] : memref<1x128xf32, #tpu.memory_space<vmem>>, vector<1x128xf32>
    %19 = vector.broadcast %18 : vector<1x128xf32> to vector<16x128xf32>
    %20 = arith.addf %17, %19 : vector<16x128xf32>
    %21 = arith.truncf %20 : vector<16x128xf32> to vector<16x128xbf16>
    %c0_16 = arith.constant 0 : index
    %c0_17 = arith.constant 0 : index
    %22 = vector.load %arg8[%c0_16, %c0_17] : memref<16x128xbf16, #tpu.memory_space<vmem>>, vector<16x128xbf16>
    tpu.vector_store %arg8[%c0_16, %c0_17], %21 {strides = array<i32>} : memref<16x128xbf16, #tpu.memory_space<vmem>>, vector<16x128xbf16>,
    return
  }
  func.func @transform_0(%arg0: i32) -> (i32, i32) {
    %c0_i32 = arith.constant 0 : i32
    %c0_i32_0 = arith.constant 0 : i32
    return %arg0, %c0_i32 : i32, i32
  }
  func.func @transform_1(%arg0: i32) -> (i32, i32) {
    %c0_i32 = arith.constant 0 : i32
    %c0_i32_0 = arith.constant 0 : i32
    return %arg0, %c0_i32 : i32, i32
  }
  func.func @transform_2(%arg0: i32) -> (i32, i32) {
    %c0_i32 = arith.constant 0 : i32
    %c0_i32_0 = arith.constant 0 : i32
    %c0_i32_1 = arith.constant 0 : i32
    return %c0_i32, %c0_i32_0 : i32, i32
  }
  func.func @transform_3(%arg0: i32) -> (i32, i32) {
    %c0_i32 = arith.constant 0 : i32
    %c0_i32_0 = arith.constant 0 : i32
    %c0_i32_1 = arith.constant 0 : i32
    return %c0_i32, %c0_i32_0 : i32, i32
  }
  func.func @transform_4(%arg0: i32) -> (i32, i32) {
    %c0_i32 = arith.constant 0 : i32
    %c0_i32_0 = arith.constant 0 : i32
    %c0_i32_1 = arith.constant 0 : i32
    return %c0_i32, %c0_i32_0 : i32, i32
  }
  func.func @transform_5(%arg0: i32) -> (i32, i32) {
    %c0_i32 = arith.constant 0 : i32
    %c0_i32_0 = arith.constant 0 : i32
    %c0_i32_1 = arith.constant 0 : i32
    return %c0_i32, %c0_i32_0 : i32, i32
  }
  func.func @transform_6(%arg0: i32) -> (i32, i32) {
    %c0_i32 = arith.constant 0 : i32
    %c0_i32_0 = arith.constant 0 : i32
    %c0_i32_1 = arith.constant 0 : i32
    return %c0_i32, %c0_i32_0 : i32, i32
  }
  func.func @transform_7(%arg0: i32) -> (i32, i32) {
    %c0_i32 = arith.constant 0 : i32
    %c0_i32_0 = arith.constant 0 : i32
    return %arg0, %c0_i32 : i32, i32
  }
}

</mosaic_0001>

<bundles_post_ra>
// kernel: tpu_custom_call.1
= control target key start
LH: loop header
LB: loop body
LE: loop exit
PB: predicated region body
PF: predicated region fallthrough
CT: control target
= control target key end

     0   :  { %12 = vsyncpa [#allocation3], 0  ;;  %s1311_s0 = inlined_call_operand.hbm [shape: bf16[16,768], index: 0, kind: input, shape index: {}]   ;;  %s1312_s1 = inlined_call_operand.hbm [shape: bf16[16,16], index: 1, kind: input, shape index: {}]   ;;  %s1313_s2 = inlined_call_operand.hbm [shape: bf16[16,32], index: 2, kind: input, shape index: {}]   ;;  %s1314_s3 = inlined_call_operand.vmem [shape: f32[1,32], index: 3, kind: input, shape index: {}]   ;;  %s1315_s4 = inlined_call_operand.hbm [shape: bf16[768,128], index: 4, kind: input, shape index: {}]   ;;  %s1316_s5 = inlined_call_operand.hbm [shape: bf16[32,128], index: 5, kind: input, shape index: {}]   ;;  %s1317_s6 = inlined_call_operand.vmem [shape: f32[1,128], index: 6, kind: input, shape index: {}]   ;;  %s1318_s7 = inlined_call_operand.hbm [shape: bf16[16,128], index: 7, kind: output, shape index: {}]  }
   0x1   :  { %13 = vsyncpa [#allocation6], 0 }
   0x2   :  { %14 = vsyncpa [#allocation9], 0  ;;  %s33_s26 = sshll.u32 %s1312_s1, 4  ;;  %s34_s26 = int_to_ptr.hbm [resolvable:$true] %s33_s26 }
   0x3   :  { %15 = vsyncpa [#allocation4], 0  ;;  %s1222_s27 = smov [#allocation5]   ;;  %s61_s8 = sshll.u32 %s1315_s4, 4  ;;  %s62_s8 = int_to_ptr.hbm [resolvable:$true] %s61_s8 }
   0x4   :  { %s35_s28 = sshll.u32 %s1222_s27, 4  ;;  %s1223_s9 = smov 64   ;;  %s36_s28 = int_to_ptr.vmem [resolvable:$true] %s35_s28 }
   0x5   :  { %s1224_s10 = smov 4   ;;  %s1225_s11 = smov [#allocation8]  }
   0x6   :  { %41 = dma.hbm_to_vmem [thread:$0]  %s34_s26, 128, %s36_s28, [#allocation6], %s1223_s9, %s1223_s9, %s1224_s10  }
   0x7   :  { %s63_s12 = sshll.u32 %s1225_s11, 4  ;;  %s20_s14 = sshll.u32 %s1311_s0, 4  ;;  %s64_s12 = int_to_ptr.vmem [resolvable:$true] %s63_s12  ;;  %s21_s14 = int_to_ptr.hbm [resolvable:$true] %s20_s14 }
   0x8   :  { %69 = dma.hbm_to_vmem [thread:$0]  %s62_s8, 6144, %s64_s12, [#allocation9], %s1223_s9, %s1223_s9, %s1224_s10  }
   0x9   :  { %s1226_s4 = smov [#allocation2]   ;;  %s46_s18 = sshll.u32 %s1313_s2, 4  ;;  %s47_s18 = int_to_ptr.hbm [resolvable:$true] %s46_s18 }
   0xa   :  { %s22_s15 = sshll.u32 %s1226_s4, 4  ;;  %s1227_s19 = smov 384   ;;  %s23_s15 = int_to_ptr.vmem [resolvable:$true] %s22_s15 }
   0xb   :  { %s1228_s20 = smov 24   ;;  %s1229_s21 = smov [#allocation7]  }
   0xc   :  { %28 = dma.hbm_to_vmem [thread:$0]  %s21_s14, 768, %s23_s15, [#allocation3], %s1227_s19, %s1227_s19, %s1228_s20  }
   0xd   :  { %s48_s22 = sshll.u32 %s1229_s21, 4  ;;  %s74_s24 = sshll.u32 %s1316_s5, 4  ;;  %s49_s22 = int_to_ptr.vmem [resolvable:$true] %s48_s22  ;;  %s75_s24 = int_to_ptr.hbm [resolvable:$true] %s74_s24 }
   0xe   :  { %54 = dma.hbm_to_vmem [thread:$0]  %s47_s18, 128, %s49_s22, [#allocation6], %s1223_s9, %s1223_s9, %s1224_s10  }
   0xf   :  { %s1230_s25 = smov [#allocation10]  }
  0x10   :  { %s76_s26 = sshll.u32 %s1230_s25, 4  ;;  %s77_s26 = int_to_ptr.vmem [resolvable:$true] %s76_s26 }
  0x11   :  { %82 = dma.hbm_to_vmem [thread:$0]  %s75_s24, 256, %s77_s26, [#allocation9], %s1223_s9, %s1223_s9, %s1224_s10  }
  0x12   :  { %1214 = dma.done.wait [#allocation3], 768  }
  0x13   :  { %1215 = vsyncadd [#allocation3], 4294966528 }
  0x14   :  { %1216 = dma.done.wait [#allocation6], 256  }
  0x15   :  { %1217 = vsyncadd [#allocation6], 4294967040 }
  0x16   :  { %1218 = dma.done.wait [#allocation9], 6400  }
  0x17   :  { %1219 = vsyncadd [#allocation9], 4294960896  ;;  %v988_v0 = vld [vmem:[#allocation7] sm:$0xff]  ;;  %v987_v2 = vld [vmem:[#allocation5] sm:$0xff]  ;;  %vm125_vm0 = vcmask 130048   ;;  %vm300_vm9 = vcmask 261120  }
  0x18   :  { %v1002_v1 = vld [vmem:[#allocation8 + $0x38] sm:$0xff]  ;;  %136 = vmatpush.bf16.msra.mxu0 %v988_v0  ;;  %v1001_v4 = vld [vmem:[#allocation8 + $0x30] sm:$0xff]  ;;  %v1000_v6 = vld [vmem:[#allocation8 + $0x28] sm:$0xff]  ;;  %s1231_s28 = smov [#allocation11]   ;;  %s736_s11 = sshll.u32 %s1318_s7, 4  ;;  %s737_s11 = int_to_ptr.hbm [resolvable:$true] %s736_s11 }
  0x19   :  { %v1010_v3 = vld [vmem:[#allocation8 + $0x78] sm:$0xff]  ;;  %636 = vmatpush.bf16.msra.mxu2 %v1002_v1  ;;  %v1009_v5 = vld [vmem:[#allocation8 + $0x70] sm:$0xff]  ;;  %v1008_v7 = vld [vmem:[#allocation8 + $0x68] sm:$0xff]  ;;  %s734_s29 = sshll.u32 %s1231_s28, 4  ;;  %s735_s29 = int_to_ptr.vmem [resolvable:$true] %s734_s29 }
  0x1a   :  { %650 = vmatpush.bf16.msra.mxu3 %v1010_v3  ;;  %v999_v8 = vld [vmem:[#allocation8 + $0x20] sm:$0xff]  ;;  %v998_v10 = vld [vmem:[#allocation8 + $0x18] sm:$0xff]  ;;  %v997_v12 = vld [vmem:[#allocation8 + $0x10] sm:$0xff] }
  0x1b   :  { %759 = vmatmul.msk.bf16.vlgmr.msra.gmra.mxu0 %vm125_vm0, %v987_v2  ;;  %v1007_v9 = vld [vmem:[#allocation8 + $0x60] sm:$0xff]  ;;  %v1006_v11 = vld [vmem:[#allocation8 + $0x58] sm:$0xff]  ;;  %v1005_v13 = vld [vmem:[#allocation8 + $0x50] sm:$0xff] }
  0x1c   :  { %v996_v14 = vld [vmem:[#allocation8 + $0x8] sm:$0xff]  ;;  %v995_v16 = vld [vmem:[#allocation8] sm:$0xff]  ;;  %v1018_v17 = vld [vmem:[#allocation8 + $0xb8] sm:$0xff] }
  0x1d   :  { %637 = vmatpush.bf16.msra.mxu2 %v1001_v4  ;;  %v1004_v15 = vld [vmem:[#allocation8 + $0x48] sm:$0xff]  ;;  %v1034_v18 = vld [vmem:[#allocation8 + $0x138] sm:$0xff]  ;;  %v1003_v19 = vld [vmem:[#allocation8 + $0x40] sm:$0xff]  ;;  %664 = vmatpush.bf16.msrb.mxu0 %v1018_v17 }
  0x1e   :  { %651 = vmatpush.bf16.msra.mxu3 %v1009_v5  ;;  %v1042_v20 = vld [vmem:[#allocation8 + $0x178] sm:$0xff]  ;;  %v1017_v21 = vld [vmem:[#allocation8 + $0xb0] sm:$0xff]  ;;  %v1044_v24 = vld [vmem:[#allocation10 + $0x8] sm:$0xff] }
  0x1f   :  { %v1033_v22 = vld [vmem:[#allocation8 + $0x130] sm:$0xff]  ;;  %v1016_v25 = vld [vmem:[#allocation8 + $0xa8] sm:$0xff]  ;;  %310 = vmatpush.bf16.msra.mxu1 %v1044_v24  ;;  %v1043_v28 = vld [vmem:[#allocation10] sm:$0xff] }
  0x20   :  { %v1041_v23 = vld [vmem:[#allocation8 + $0x170] sm:$0xff]  ;;  %v1032_v26 = vld [vmem:[#allocation8 + $0x128] sm:$0xff]  ;;  %v1015_v29 = vld [vmem:[#allocation8 + $0xa0] sm:$0xff] }
  0x21   :  { %638 = vmatpush.bf16.msra.mxu2 %v1000_v6  ;;  %665 = vmatpush.bf16.msrb.mxu0 %v1017_v21  ;;  %v1040_v27 = vld [vmem:[#allocation8 + $0x168] sm:$0xff]  ;;  %v1026_v30 = vld [vmem:[#allocation8 + $0xf8] sm:$0xff]  ;;  %v1031_v31 = vld [vmem:[#allocation8 + $0x120] sm:$0xff] }
  0x22   :  { %652 = vmatpush.bf16.msra.mxu3 %v1008_v7  ;;  %v1039_v32 = vld [vmem:[#allocation8 + $0x160] sm:$0xff]  ;;  %v992_v34 = vld [vmem:[#allocation2 + $0x14] sm:$0xf0]  ;;  %v1025_v38 = vld [vmem:[#allocation8 + $0xf0] sm:$0xff] }
  0x23   :  { %311 = vmatpush.bf16.msra.mxu1 %v1043_v28  ;;  %v773_v33 = vld [vmem:[#allocation2] sm:$0xf]  ;;  %v1014_v37 = vld [vmem:[#allocation8 + $0x98] sm:$0xff]  ;;  %v989_v40 = vld [vmem:[#allocation2 + $0x4] sm:$0xf] }
  0x24   :  { %v1060_v35 = vld [vmem:[%s1314_s3] ss:$0 sm:$0xff]  ;;  %v774_v36 = vor.u32 %v992_v34, %v773_v33  ;;  %v1030_v39 = vld [vmem:[#allocation8 + $0x118] sm:$0xff]  ;;  %v1013_v44 = vld [vmem:[#allocation8 + $0x90] sm:$0xff] }
  0x25   :  { %639 = vmatpush.bf16.msra.mxu2 %v999_v8  ;;  %666 = vmatpush.bf16.msrb.mxu0 %v1016_v25  ;;  %v775_v41 = vld [vmem:[#allocation2 + $0x18] sm:$0xf0]  ;;  %v1024_v45 = vld [vmem:[#allocation8 + $0xe8] sm:$0xff]  ;;  %v1029_v46 = vld [vmem:[#allocation8 + $0x110] sm:$0xff] }
  0x26   :  { %653 = vmatpush.bf16.msra.mxu3 %v1007_v9  ;;  %v1038_v42 = vld [vmem:[#allocation8 + $0x158] sm:$0xff]  ;;  %v778_v43 = vor.u32 %v989_v40, %v775_v41  ;;  %v1037_v49 = vld [vmem:[#allocation8 + $0x150] sm:$0xff]  ;;  %v1012_v50 = vld [vmem:[#allocation8 + $0x88] sm:$0xff] }
  0x27   :  { %678 = vmatpush.bf16.msrb.mxu1 %v1026_v30  ;;  %v1023_v51 = vld [vmem:[#allocation8 + $0xe0] sm:$0xff]  ;;  %v1028_v53 = vld [vmem:[#allocation8 + $0x108] sm:$0xff]  ;;  %v1022_v57 = vld [vmem:[#allocation8 + $0xd8] sm:$0xff] }
  0x28   :  { %v1036_v54 = vld [vmem:[#allocation8 + $0x148] sm:$0xff]  ;;  %v1011_v56 = vld [vmem:[#allocation8 + $0x80] sm:$0xff]  ;;  %v789_v0 = vld [vmem:[#allocation2 + $0x10] sm:$0xf] }
  0x29   :  { %640 = vmatpush.bf16.msra.mxu2 %v998_v10  ;;  %667 = vmatpush.bf16.msrb.mxu0 %v1015_v29  ;;  %v1027_v58 = vld [vmem:[#allocation8 + $0x100] sm:$0xff]  ;;  %v781_v61 = vld [vmem:[#allocation2 + $0x8] sm:$0xf]  ;;  %v1021_v2 = vld [vmem:[#allocation8 + $0xd0] sm:$0xff] }
  0x2a   :  { %654 = vmatpush.bf16.msra.mxu3 %v1006_v11  ;;  %v1035_v60 = vld [vmem:[#allocation8 + $0x140] sm:$0xff]  ;;  %v994_v1 = vld [vmem:[#allocation2 + $0x24] sm:$0xf0]  ;;  %v991_v6 = vld [vmem:[#allocation2 + $0x14] sm:$0xf] }
  0x2b   :  { %679 = vmatpush.bf16.msrb.mxu1 %v1025_v38  ;;  %v993_v62 = vld [vmem:[#allocation2 + $0x1c] sm:$0xf0]  ;;  %v790_v5 = vor.u32 %v994_v1, %v789_v0  ;;  %v791_v7 = vld [vmem:[#allocation2 + $0x28] sm:$0xf0] }
  0x2c   :  { %v782_v63 = vor.u32 %v993_v62, %v781_v61  ;;  %v794_v9 = vor.u32 %v991_v6, %v791_v7  ;;  %v1020_v10 = vld [vmem:[#allocation8 + $0xc8] sm:$0xff]  ;;  %v1019_v11 = vld [vmem:[#allocation8 + $0xc0] sm:$0xff] }
  0x2d   :  { %641 = vmatpush.bf16.msra.mxu2 %v997_v12  ;;  %668 = vmatpush.bf16.msrb.mxu0 %v1014_v37  ;;  %v1061_v61 = vld [vmem:[%s1317_s6] ss:$0 sm:$0xff] }
  0x2e   :  { %655 = vmatpush.bf16.msra.mxu3 %v1005_v13 }
  0x2f   :  { %680 = vmatpush.bf16.msrb.mxu1 %v1024_v45 }
  0x31   :  { %642 = vmatpush.bf16.msra.mxu2 %v996_v14  ;;  %669 = vmatpush.bf16.msrb.mxu0 %v1013_v44 }
  0x32   :  { %656 = vmatpush.bf16.msra.mxu3 %v1004_v15 }
  0x33   :  { %681 = vmatpush.bf16.msrb.mxu1 %v1023_v51 }
  0x35   :  { %643 = vmatpush.bf16.msra.mxu2 %v995_v16  ;;  %670 = vmatpush.bf16.msrb.mxu0 %v1012_v50 }
  0x36   :  { %657 = vmatpush.bf16.msra.mxu3 %v1003_v19 }
  0x37   :  { %682 = vmatpush.bf16.msrb.mxu1 %v1022_v57 }
  0x38   :  { %644 = vmatmul.bf16.vlgmr.msra.gmra.mxu2 %v774_v36  ;;  %v783_v36 = vld [vmem:[#allocation2 + $0x20] sm:$0xf0] }
  0x39   :  { %692 = vmatpush.bf16.msrb.mxu2 %v1034_v18  ;;  %658 = vmatmul.bf16.vlgmr.msra.gmra.mxu3 %v778_v43 }
  0x3a   :  { %706 = vmatpush.bf16.msrb.mxu3 %v1042_v20  ;;  %671 = vmatpush.bf16.msrb.mxu0 %v1011_v56 }
  0x3b   :  { %683 = vmatpush.bf16.msrb.mxu1 %v1021_v2 }
  0x3d   :  { %693 = vmatpush.bf16.msrb.mxu2 %v1033_v22  ;;  %672 = vmatmul.bf16.vlgmr.msrb.gmra.mxu0 %v782_v63 }
  0x3e   :  { %707 = vmatpush.bf16.msrb.mxu3 %v1041_v23 }
  0x3f   :  { %684 = vmatpush.bf16.msrb.mxu1 %v1020_v10 }
  0x41   :  { %694 = vmatpush.bf16.msrb.mxu2 %v1032_v26 }
  0x42   :  { %708 = vmatpush.bf16.msrb.mxu3 %v1040_v27 }
  0x43   :  { %685 = vmatpush.bf16.msrb.mxu1 %v1019_v11 }
  0x45   :  { %695 = vmatpush.bf16.msrb.mxu2 %v1031_v31 }
  0x46   :  { %709 = vmatpush.bf16.msrb.mxu3 %v1039_v32 }
  0x49   :  { %696 = vmatpush.bf16.msrb.mxu2 %v1030_v39 }
  0x4a   :  { %710 = vmatpush.bf16.msrb.mxu3 %v1038_v42 }
  0x4d   :  { %697 = vmatpush.bf16.msrb.mxu2 %v1029_v46 }
  0x4e   :  { %711 = vmatpush.bf16.msrb.mxu3 %v1037_v49 }
  0x51   :  { %698 = vmatpush.bf16.msrb.mxu2 %v1028_v53 }
  0x52   :  { %712 = vmatpush.bf16.msrb.mxu3 %v1036_v54 }
  0x55   :  { %699 = vmatpush.bf16.msrb.mxu2 %v1027_v58 }
  0x56   :  { %713 = vmatpush.bf16.msrb.mxu3 %v1035_v60 }
  0x58   :  { %700 = vmatmul.bf16.vlgmr.msrb.gmra.mxu2 %v790_v5 }
  0x59   :  { %714 = vmatmul.bf16.vlgmr.msrb.gmra.mxu3 %v794_v9 }
  0x98   :  { %v138_v47 = vpop.f32.mrf.mxu0 }
  0x99   :  { %v139_v48 = vadd.f32 %v1060_v35, %v138_v47 }
  0x9b   :  { %v760_v52 = vmul.f32 -1.442695, %v139_v48 }
  0x9d   :  { %1062 = vpow2.f32 %v760_v52 }
  0xa0   :  { %v140_v55 = vpop.f32.mrf.mxu0 }
  0xa1   :  { %v141_v59 = vadd.f32 %v1060_v35, %v140_v55  ;;  %v990_v35 = vld [vmem:[#allocation2 + $0xc] sm:$0xf] }
  0xa2   :  { %v786_v37 = vor.u32 %v990_v35, %v783_v36 }
  0xa3   :  { %v1063_v3 = vpop.eup %1062  ;;  %v761_v4 = vmul.f32 -1.442695, %v141_v59 }
  0xa4   :  { %v149_v8 = vadd.f32 1.0, %v1063_v3 }
  0xa5   :  { %1064 = vpow2.f32 %v761_v4 }
  0xa6   :  { %1066 = vrcp.f32 %v149_v8  ;;  %vm156_vm2 = vweird.f32 %v149_v8  ;;  %v162_v22 = vand.u32 2147483648, %v149_v8  ;;  %v160_v24 = vand.u32 2147483647, %v149_v8 }
  0xa8   :  { %v163_v29 = vor.u32 1.1754944e-38, %v162_v22  ;;  %vm161_vm7 = vcmp.eq.f32.partialorder %v160_v24, 8.507059e+37 }
  0xab   :  { %v1065_v12 = vpop.eup %1064 }
  0xac   :  { %v1067_v13 = vpop.eup %1066  ;;  %v150_v14 = vadd.f32 1.0, %v1065_v12 }
  0xad   :  { %v152_v15 = vmul.f32 %v1067_v13, %v149_v8  ;;  %vm157_vm1 = vweird.f32 %v1067_v13 }
  0xae   :  { %1068 = vrcp.f32 %v150_v14  ;;  %v177_v23 = vand.u32 2147483648, %v150_v14  ;;  %v175_v26 = vand.u32 2147483647, %v150_v14  ;;  %vm158_vm4 = vmor %vm156_vm2, %vm157_vm1  ;;  %vm171_vm5 = vweird.f32 %v150_v14 }
  0xaf   :  { %v153_v16 = vsub.f32 1.0, %v152_v15 }
  0xb0   :  { %v178_v30 = vor.u32 1.1754944e-38, %v177_v23  ;;  %vm176_vm8 = vcmp.eq.f32.partialorder %v175_v26, 8.507059e+37 }
  0xb1   :  { %v154_v17 = vmul.f32 %v1067_v13, %v153_v16 }
  0xb3   :  { %v155_v20 = vadd.f32 %v1067_v13, %v154_v17 }
  0xb4   :  { %v1069_v18 = vpop.eup %1068 }
  0xb5   :  { %v167_v19 = vmul.f32 %v1069_v18, %v150_v14  ;;  %vm172_vm3 = vweird.f32 %v1069_v18  ;;  %v159_v27 = vsel %vm158_vm4, %v1067_v13, %v155_v20 }
  0xb6   :  { %vm173_vm6 = vmor %vm171_vm5, %vm172_vm3  ;;  %v164_v32 = vsel %vm161_vm7, %v163_v29, %v159_v27 }
  0xb7   :  { %v168_v21 = vsub.f32 1.0, %v167_v19 }
  0xb9   :  { %v169_v25 = vmul.f32 %v1069_v18, %v168_v21 }
  0xba   :  { %v673_v45 = vpop.f32.mrf.mxu0 }
  0xbb   :  { %v170_v28 = vadd.f32 %v1069_v18, %v169_v25  ;;  %v645_v38 = vpop.f32.mrf.mxu2 }
  0xbc   :  { %v659_v39 = vpop.f32.mrf.mxu3 }
  0xbd   :  { %v174_v31 = vsel %vm173_vm6, %v1069_v18, %v170_v28 }
  0xbe   :  { %v179_v33 = vsel %vm176_vm8, %v178_v30, %v174_v31 }
  0xbf   :  { %v283_v34 = vpack.c.bf16 %v179_v33, %v164_v32 }
  0xc1   :  { %770 = vmatmul.msk.bf16.vlgmr.msra.gmra.mxu1 %vm300_vm9, %v283_v34 }
  0xc2   :  { %v675_v54 = vpop.f32.mrf.mxu0 }
  0xc3   :  { %v647_v41 = vpop.f32.mrf.mxu2 }
  0xc4   :  { %v661_v42 = vpop.f32.mrf.mxu3 }
  0xd1   :  { %686 = vmatmul.bf16.vlgmr.msrb.gmra.mxu1 %v786_v37 }
  0xdb   :  { %v701_v48 = vpop.f32.mrf.mxu2 }
  0xdc   :  { %v715_v51 = vpop.f32.mrf.mxu3 }
  0xe3   :  { %v703_v59 = vpop.f32.mrf.mxu2 }
  0xe4   :  { %v717_v63 = vpop.f32.mrf.mxu3 }
 0x13e   :  { %v313_v40 = vpop.f32.mrf.mxu1 }
 0x13f   :  { %v646_v44 = vadd.f32 %v645_v38, %v313_v40 }
 0x141   :  { %v660_v46 = vadd.f32 %v659_v39, %v646_v44 }
 0x143   :  { %v674_v50 = vadd.f32 %v673_v45, %v660_v46 }
 0x146   :  { %v315_v43 = vpop.f32.mrf.mxu1 }
 0x147   :  { %v648_v47 = vadd.f32 %v647_v41, %v315_v43 }
 0x149   :  { %v662_v52 = vadd.f32 %v661_v42, %v648_v47 }
 0x14b   :  { %v676_v55 = vadd.f32 %v675_v54, %v662_v52 }
 0x14e   :  { %v687_v49 = vpop.f32.mrf.mxu1 }
 0x14f   :  { %v688_v53 = vadd.f32 %v687_v49, %v674_v50 }
 0x151   :  { %v702_v56 = vadd.f32 %v701_v48, %v688_v53 }
 0x153   :  { %v716_v60 = vadd.f32 %v715_v51, %v702_v56 }
 0x155   :  { %v724_v1 = vadd.f32 %v1061_v61, %v716_v60 }
 0x156   :  { %v689_v57 = vpop.f32.mrf.mxu1 }
 0x157   :  { %v690_v58 = vadd.f32 %v689_v57, %v676_v55 }
 0x159   :  { %v704_v62 = vadd.f32 %v703_v59, %v690_v58 }
 0x15b   :  { %v718_v0 = vadd.f32 %v717_v63, %v704_v62 }
 0x15d   :  { %v725_v2 = vadd.f32 %v1061_v61, %v718_v0 }
 0x15f   :  { %v1048_v3 = vpack.c.bf16 %v725_v2, %v724_v1 }
 0x161   :  { %1049 = vst [vmem:[#allocation11] sm:$0xff] %v1048_v3  }
 0x162   :  { %742 = dma.vmem_to_hbm [thread:$0]  %s735_s29, 128, %s737_s11, [#allocation4], %s1223_s9, %s1223_s9, %s1224_s10  }
 0x163   :  { %1220 = dma.done.wait [#allocation4], 128  }
 0x164   :  { %1221 = vsyncadd [#allocation4], 4294967168 }
 0x165   :  { %747 = vsyncpa [#allocation3], 1 }
 0x166   :  { %748 = vsyncpa [#allocation6], 1 }
 0x167   :  { %749 = vsyncpa [#allocation9], 1 }
 0x168   :  { %750 = vsyncpa [#allocation4], 1 }

</bundles_post_ra>
